<compile_context>
chip_gen: v5e
topology: v5e:2x2
jax: 0.10.0
libtpu: 0.0.40
codegen_flags: <defaults>
</compile_context>

<pallas_src>
import functools

import jax
import jax.numpy as jnp
from jax.experimental import pallas as pl
from jax.experimental.pallas import tpu as pltpu


_INV_SQRT2 = 0.7071067811865476


def _gelu_exact(x):
    # nn.GELU default: 0.5 * x * (1 + erf(x / sqrt(2)))
    return 0.5 * x * (1.0 + jax.lax.erf(x * _INV_SQRT2))


def _round_up(a, b):
    return ((a + b - 1) // b) * b


def _cdiv(a, b):
    return (a + b - 1) // b


def _mlp_kernel(x_ref, w1_ref, b1_ref, w2_ref, b2_ref, o_ref, *, approximate_gelu):
    x = x_ref[...]
    if x.dtype != w1_ref.dtype:
        # In-kernel cast of the row tile (cheap VPU work) instead of a separate
        # HBM-round-trip cast pass in the wrapper.
        x = x.astype(w1_ref.dtype)
    # fc1: native-dtype operands on the MXU, f32 accumulation.
    h = jnp.dot(x, w1_ref[...], preferred_element_type=jnp.float32)
    h = h + b1_ref[...]  # b1 kept in f32
    if approximate_gelu:
        # Opt-in tanh GELU: moves the transcendental to the otherwise-idle EUP
        # slot (VALU relief on v6e/v7x) but deviates from nn.GELU's exact erf.
        h = jax.nn.gelu(h, approximate=True)
    else:
        # Exact erf (matches the PyTorch module). NOTE: lowers to a VALU
        # polynomial; audit the bundle on v6e/v7x and flip approximate_gelu=True
        # only if the accuracy budget allows.
        h = _gelu_exact(h)
    # drop(p=0.0) is the identity.
    # TODO(synk): dropout with p>0 (training) would need pltpu.prng_seed /
    # prng_random_bits; the module default drop=0.0 makes it a no-op here.
    h = h.astype(w2_ref.dtype)
    # fc2
    y = jnp.dot(h, w2_ref[...], preferred_element_type=jnp.float32)
    y = y + b2_ref[...]  # b2 kept in f32
    o_ref[...] = y.astype(o_ref.dtype)


def _pick_vmem_limit(rt, C, H, C_out_p, act_itemsize, w_itemsize):
    # Worst case: the Buffered(1) fallback double-buffers the resident weights.
    weights = (C * H + H * C_out_p) * w_itemsize * 2
    biases = (H + C_out_p) * 4 * 2
    io_tiles = 2 * rt * (C + C_out_p) * act_itemsize      # double-buffered x / out
    interm = rt * H * (4 + w_itemsize)                    # f32 h + cast copy
    need = weights + biases + io_tiles + interm + (8 << 20)  # headroom
    try:
        cap = pltpu.get_tpu_info().vmem_capacity_bytes
    except Exception:
        cap = 64 << 20  # conservative: v7x per-TC VMEM
    # Clamp: at least the default-ish 32 MiB, never past cap - 8 MiB
    # (=> ~56 MiB ceiling on v7x, ~120 MiB on v5e/v6e).
    return int(min(max(need, 32 << 20), cap - (8 << 20)))


def make_mlp(w1, b1, w2, b2, *, compute_dtype=None, rows_tile=None,
             approximate_gelu=False, vmem_limit_bytes=None):
    """One-time parameter prep; returns forward(x) for x of shape (B, N, C).

    w1: (C, H), b1: (H,), w2: (H, C_out), b2: (C_out,)   (transposed relative
    to nn.Linear.weight).  compute_dtype (e.g. jnp.bfloat16) optionally sets
    the MXU operand dtype — accumulation stays f32; leave None for strict f32.
    """
    C, H = w1.shape
    H2, C_out = w2.shape
    assert H2 == H and b1.shape == (H,) and b2.shape == (C_out,)

    # ---- one-time parameter prep (hoisted out of the per-call path) ----
    # Lane-dense output: pad C_out to a multiple of 128 ONCE.  For realistic
    # ViT widths (multiples of 128) this is a no-op and no output slice occurs.
    C_out_p = _round_up(C_out, 128)
    w2_p = w2 if C_out_p == C_out else jnp.pad(w2, ((0, 0), (0, C_out_p - C_out)))
    b2_p = b2 if C_out_p == C_out else jnp.pad(b2, (0, C_out_p - C_out))
    b1_2 = b1.reshape(1, H).astype(jnp.float32)
    b2_2 = b2_p.reshape(1, C_out_p).astype(jnp.float32)
    if compute_dtype is not None:
        w1 = w1.astype(compute_dtype)
        w2_p = w2_p.astype(compute_dtype)
    w_itemsize = jnp.dtype(w1.dtype).itemsize
    # TODO(synk): for very wide MLPs on v7x (resident weights > ~half of 64 MiB,
    # e.g. C=1536/H=6144 bf16) add an H grid axis with a VMEM f32 accumulator
    # instead of keeping both weights fully resident.

    kernel = functools.partial(_mlp_kernel, approximate_gelu=approximate_gelu)

    def forward(x):
        B, N, Cx = x.shape
        assert Cx == C
        rows = B * N
        act_itemsize = jnp.dtype(x.dtype).itemsize

        # ---- row tile selection ----
        align = 16 if w_itemsize == 2 else 8      # bf16 sublane packing
        base_rt = rows_tile if rows_tile is not None else (512 if rows >= 4096 else 256)
        rt = _round_up(min(base_rt, _round_up(rows, align)), align)
        # Ensure >=2 grid steps so the "parallel" row axis feeds both v7x
        # TensorCores (no effect for large rows; negligible on 1-TC chips).
        if rows > align:
            rt = min(rt, max(align, _round_up(_cdiv(rows, 2), align)))
        grid = (_cdiv(rows, rt),)                 # partial last block is masked by Pallas

        x2 = x.reshape(rows, C)                   # contiguous reshape: no HBM copy, no pad

        vlim = (_pick_vmem_limit(rt, C, H, C_out_p, act_itemsize, w_itemsize)
                if vmem_limit_bytes is None else vmem_limit_bytes)

        cost = pl.CostEstimate(
            flops=2 * rows * (C * H + H * C_out_p),
            transcendentals=0,  # exact-erf GELU lowers to a VALU polynomial, not EUP
            bytes_accessed=rows * (C + C_out_p) * act_itemsize
            + (C * H + H * C_out_p) * w_itemsize + (H + C_out_p) * 4,
        )

        def build(single_buffer_weights):
            def const_spec(shape):
                # Weights/biases have a constant index_map; single-buffer them
                # so they stay resident with half the VMEM footprint.
                if single_buffer_weights:
                    return pl.BlockSpec(shape, lambda i: (0, 0),
                                        pipeline_mode=pl.Buffered(1))
                # TODO(synk): if this fallback is taken and the trace shows the
                # constant-index weight blocks being re-fetched per grid step,
                # stage w1/w2 in VMEM scratch via a one-time
                # pltpu.make_async_copy under @pl.when(pl.program_id(0) == 0).
                return pl.BlockSpec(shape, lambda i: (0, 0))

            return pl.pallas_call(
                kernel,
                out_shape=jax.ShapeDtypeStruct((rows, C_out_p), x.dtype),
                grid_spec=pltpu.PrefetchScalarGridSpec(
                    num_scalar_prefetch=0,
                    grid=grid,
                    in_specs=[
                        pl.BlockSpec((rt, C), lambda i: (i, 0)),   # x row tile
                        const_spec((C, H)),                        # w1 (resident)
                        const_spec((1, H)),                        # b1
                        const_spec((H, C_out_p)),                  # w2 (resident)
                        const_spec((1, C_out_p)),                  # b2
                    ],
                    out_specs=pl.BlockSpec((rt, C_out_p), lambda i: (i, 0)),
                ),
                compiler_params=pltpu.CompilerParams(
                    dimension_semantics=("parallel",),
                    vmem_limit_bytes=vlim,
                ),
                cost_estimate=cost,
            )

        try:
            out = build(True)(x2, w1, b1_2, w2_p, b2_2)
        except (TypeError, NotImplementedError, pltpu.LoweringException):
            # Narrow fallback: only when Buffered(1) single-buffering itself is
            # rejected by this jax version; other failures (e.g. VMEM OOM)
            # propagate instead of being silently downgraded.
            out = build(False)(x2, w1, b1_2, w2_p, b2_2)

        if C_out_p != C_out:
            out = out[:, :C_out]                  # only for non-128-multiple widths
        return out.reshape(B, N, C_out)

    return forward


def mlp_reference(x, w1, b1, w2, b2):
    h = jnp.einsum("bnc,ch->bnh", x, w1) + b1
    h = _gelu_exact(h)
    return jnp.einsum("bnh,hc->bnc", h, w2) + b2


if __name__ == "__main__":
    # Small shapes consistent with the module: tokens (B, N, C), mlp_ratio=4.
    B, N = 2, 64
    in_features = 32
    hidden_features = 128
    out_features = in_features

    key = jax.random.PRNGKey(0)
    k_x, k_w1, k_b1, k_w2, k_b2 = jax.random.split(key, 5)

    x = jax.random.normal(k_x, (B, N, in_features), dtype=jnp.float32)
    # Parameters stored transposed relative to nn.Linear.weight (out, in).
    w1 = (jax.random.normal(k_w1, (in_features, hidden_features), dtype=jnp.float32)
          * (in_features ** -0.5))
    b1 = jax.random.normal(k_b1, (hidden_features,), dtype=jnp.float32) * 0.02
    w2 = (jax.random.normal(k_w2, (hidden_features, out_features), dtype=jnp.float32)
          * (hidden_features ** -0.5))
    b2 = jax.random.normal(k_b2, (out_features,), dtype=jnp.float32) * 0.02

    y_ref = mlp_reference(x, w1, b1, w2, b2)

    # Strict-f32 path (bit-faithful to the exact-erf nn.GELU module numerics).
    mlp_f32 = make_mlp(w1, b1, w2, b2)
    y = jax.block_until_ready(mlp_f32(x))
    assert y.shape == (B, N, out_features)
    assert jnp.allclose(y, y_ref, atol=1e-4, rtol=1e-4), "f32 mismatch vs reference"

    # Opt-in bf16 MXU-operand path (recommended for peak MXU on all
    # generations; f32 accumulation, so only mixed-precision-level deviation).
    mlp_bf16 = make_mlp(w1, b1, w2, b2, compute_dtype=jnp.bfloat16)
    y_bf16 = jax.block_until_ready(mlp_bf16(x))
    assert y_bf16.shape == (B, N, out_features)
    assert jnp.allclose(y_bf16, y_ref, atol=2e-1, rtol=2e-1), "bf16 mismatch vs reference"

    print("KERNEL_OK")
</pallas_src>

<mosaic_0001>
module attributes {stable_mosaic.version = 11 : i64} {
  func.func @_mlp_kernel(%arg0: i32, %arg1: memref<64x32xf32, #tpu.memory_space<vmem>>, %arg2: memref<32x128xf32, #tpu.memory_space<vmem>>, %arg3: memref<1x128xf32, #tpu.memory_space<vmem>>, %arg4: memref<128x128xf32, #tpu.memory_space<vmem>>, %arg5: memref<1x128xf32, #tpu.memory_space<vmem>>, %arg6: memref<64x128xf32, #tpu.memory_space<vmem>>) attributes {dimension_semantics = [#tpu.dimension_semantics<parallel>], iteration_bounds = array<i64: 2>, scalar_prefetch = 0 : i64, scratch_operands = 0 : i64, tpu.core_type = #tpu.core_type<tc>, window_params = [{transform_indices = @transform_0, window_bounds = array<i64: 64, 32>}, {pipeline_mode = #tpu.pipeline_mode<synchronous>, transform_indices = @transform_1, window_bounds = array<i64: 32, 128>}, {pipeline_mode = #tpu.pipeline_mode<synchronous>, transform_indices = @transform_2, window_bounds = array<i64: 1, 128>}, {pipeline_mode = #tpu.pipeline_mode<synchronous>, transform_indices = @transform_3, window_bounds = array<i64: 128, 128>}, {pipeline_mode = #tpu.pipeline_mode<synchronous>, transform_indices = @transform_4, window_bounds = array<i64: 1, 128>}, {transform_indices = @transform_5, window_bounds = array<i64: 64, 128>}]} {
    %c0 = arith.constant 0 : index
    %c0_0 = arith.constant 0 : index
    %0 = vector.load %arg1[%c0, %c0_0] : memref<64x32xf32, #tpu.memory_space<vmem>>, vector<64x32xf32>
    %c0_1 = arith.constant 0 : index
    %c0_2 = arith.constant 0 : index
    %1 = vector.load %arg2[%c0_1, %c0_2] : memref<32x128xf32, #tpu.memory_space<vmem>>, vector<32x128xf32>
    %cst = arith.constant dense<0.000000e+00> : vector<64x128xf32>
    %2 = tpu.matmul %0, %1, %cst {dimension_numbers = #tpu.dot_dimension_numbers<[1], [0], [0], [1], [0, 0, 1, 1], [], []>} : vector<64x32xf32>, vector<32x128xf32>, vector<64x128xf32> -> vector<64x128xf32>
    %c0_3 = arith.constant 0 : index
    %c0_4 = arith.constant 0 : index
    %3 = vector.load %arg3[%c0_3, %c0_4] : memref<1x128xf32, #tpu.memory_space<vmem>>, vector<1x128xf32>
    %4 = vector.broadcast %3 : vector<1x128xf32> to vector<64x128xf32>
    %5 = arith.addf %2, %4 : vector<64x128xf32>
    %cst_5 = arith.constant 5.000000e-01 : f32
    %6 = vector.broadcast %cst_5 : f32 to vector<64x128xf32>
    %7 = arith.mulf %6, %5 : vector<64x128xf32>
    %cst_6 = arith.constant 0.707106769 : f32
    %8 = vector.broadcast %cst_6 : f32 to vector<64x128xf32>
    %9 = arith.mulf %5, %8 : vector<64x128xf32>
    %10 = math.erf %9 : vector<64x128xf32>
    %cst_7 = arith.constant 1.000000e+00 : f32
    %11 = vector.broadcast %cst_7 : f32 to vector<64x128xf32>
    %12 = arith.addf %11, %10 : vector<64x128xf32>
    %13 = arith.mulf %7, %12 : vector<64x128xf32>
    %c0_8 = arith.constant 0 : index
    %c0_9 = arith.constant 0 : index
    %14 = vector.load %arg4[%c0_8, %c0_9] : memref<128x128xf32, #tpu.memory_space<vmem>>, vector<128x128xf32>
    %cst_10 = arith.constant dense<0.000000e+00> : vector<64x128xf32>
    %15 = tpu.matmul %13, %14, %cst_10 {dimension_numbers = #tpu.dot_dimension_numbers<[1], [0], [0], [1], [0, 0, 1, 1], [], []>} : vector<64x128xf32>, vector<128x128xf32>, vector<64x128xf32> -> vector<64x128xf32>
    %c0_11 = arith.constant 0 : index
    %c0_12 = arith.constant 0 : index
    %16 = vector.load %arg5[%c0_11, %c0_12] : memref<1x128xf32, #tpu.memory_space<vmem>>, vector<1x128xf32>
    %17 = vector.broadcast %16 : vector<1x128xf32> to vector<64x128xf32>
    %18 = arith.addf %15, %17 : vector<64x128xf32>
    %c0_13 = arith.constant 0 : index
    %c0_14 = arith.constant 0 : index
    %19 = vector.load %arg6[%c0_13, %c0_14] : memref<64x128xf32, #tpu.memory_space<vmem>>, vector<64x128xf32>
    tpu.vector_store %arg6[%c0_13, %c0_14], %18 {strides = array<i32>} : memref<64x128xf32, #tpu.memory_space<vmem>>, vector<64x128xf32>,
    return
  }
  func.func @transform_0(%arg0: i32) -> (i32, i32) {
    %c0_i32 = arith.constant 0 : i32
    %c0_i32_0 = arith.constant 0 : i32
    return %arg0, %c0_i32 : i32, i32
  }
  func.func @transform_1(%arg0: i32) -> (i32, i32) {
    %c0_i32 = arith.constant 0 : i32
    %c0_i32_0 = arith.constant 0 : i32
    %c0_i32_1 = arith.constant 0 : i32
    return %c0_i32, %c0_i32_0 : i32, i32
  }
  func.func @transform_2(%arg0: i32) -> (i32, i32) {
    %c0_i32 = arith.constant 0 : i32
    %c0_i32_0 = arith.constant 0 : i32
    %c0_i32_1 = arith.constant 0 : i32
    return %c0_i32, %c0_i32_0 : i32, i32
  }
  func.func @transform_3(%arg0: i32) -> (i32, i32) {
    %c0_i32 = arith.constant 0 : i32
    %c0_i32_0 = arith.constant 0 : i32
    %c0_i32_1 = arith.constant 0 : i32
    return %c0_i32, %c0_i32_0 : i32, i32
  }
  func.func @transform_4(%arg0: i32) -> (i32, i32) {
    %c0_i32 = arith.constant 0 : i32
    %c0_i32_0 = arith.constant 0 : i32
    %c0_i32_1 = arith.constant 0 : i32
    return %c0_i32, %c0_i32_0 : i32, i32
  }
  func.func @transform_5(%arg0: i32) -> (i32, i32) {
    %c0_i32 = arith.constant 0 : i32
    %c0_i32_0 = arith.constant 0 : i32
    return %arg0, %c0_i32 : i32, i32
  }
}

</mosaic_0001>

<bundles_post_ra>
// kernel: tpu_custom_call.1
= control target key start
LH: loop header
LB: loop body
LE: loop exit
PB: predicated region body
PF: predicated region fallthrough
CT: control target
= control target key end

     0   :  { %10 = vsyncpa [#allocation3], 0  ;;  %s1431_s0 = inlined_call_operand.vmem [shape: f32[128,32], index: 0, kind: input, shape index: {}]   ;;  %s1432_s1 = inlined_call_operand.vmem [shape: f32[32,128], index: 1, kind: input, shape index: {}]   ;;  %s1433_s2 = inlined_call_operand.vmem [shape: f32[1,128], index: 2, kind: input, shape index: {}]   ;;  %s1434_s3 = inlined_call_operand.vmem [shape: f32[128,128], index: 3, kind: input, shape index: {}]   ;;  %s1435_s4 = inlined_call_operand.vmem [shape: f32[1,128], index: 4, kind: input, shape index: {}]   ;;  %s1436_s5 = inlined_call_operand.hbm [shape: f32[128,128], index: 5, kind: output, shape index: {}]  }
   0x1   :  { %12 = vsyncpa [#allocation3 + $0x1], 0  ;;  %s1027_s18 = smov 0   ;;  %s1029_s19 = smov 0  }
   0x2   :  { %s1031_s20 = smov 0   ;;  %s1033_s21 = smov 0  }
   0x3 LB: > { %s1048_s22 = sadd.s32 4294967295, %s993_s21   ;;  %s807_s23 = sadd.s32 4294967294, %s993_s21   ;;  %s993_s21 = sphi %s1033_s21, %s1444_s21   ;;  %s989_s20 = sphi %s1031_s20, %s1443_s20   ;;  %s985_s19 = sphi %s1029_s19, %s1442_s19   ;;  %s981_s18 = sphi %s1027_s18, %s1441_s18  }
   0x4   : > { %s1052_s24 = sadd.s32 1, %s993_s21   ;;  %s135_s25 = sadd.s32 1, %s989_s20 }
   0x5   : > { %s132_s26 = ssub.s32 %s993_s21, %s1052_s24  ;;  %p145_p0 = scmp.ne.s32.totalorder %s989_s20, %s985_s19 }
   0x6   : > { %p133_p1 = scmp.eq.s32.totalorder %s132_s26, 0  ;;  %p146_p2 = scmp.eq.s32.totalorder %s1048_s22, 1 }
   0x7   : > { %p151_p3 = scmp.ne.s32.totalorder %s985_s19, %s981_s18  ;;  %p152_p4 = scmp.eq.s32.totalorder %s807_s23, 1 }
   0x8   : > { %s1063_s27 = scalar_select %p133_p1, %s989_s20, %s135_s25  }
   0x9   : > { %p1065_p5 = por %p146_p2, %p145_p0  ;;  %p1069_p6 = por %p152_p4, %p151_p3 }
   0xa   : > { %p810_p7 = scmp.ge.s32.totalorder %s993_s21, 1  ;;  %p191_p8 = scmp.lt.s32.totalorder %s993_s21, 3 }
   0xc   : > { %p192_p9 = pnand %p810_p7, %p191_p8 }
   0xd   : > { %s812_s9 = sshll.u32 (!%p192_p9), %s1048_s22, 3  ;;  %s216_s26 = sand.u32 (!%p192_p9), 1, %s985_s19  }
   0xe   : > { %195 = sbr.rel (%p192_p9) target bundleno = 403 (0x193), region = 40  ;;  %p220_p10 = scmp.lt.s32.totalorder (!%p192_p9), %s812_s9, 15 }
   0xf   : > { %s811_s30 = sshll.u32 (!%p192_p9), %s216_s26, 6  ;;  %s730_s15 = scalar_lea.sflag (!%p192_p9), [#allocation3], %s216_s26 }
  0x10   : > { %s218_s8 = scalar_lea.vmem (!%p192_p9), [#allocation2], %s811_s30  ;;  %s951_s25 = scalar_lea.hbm (!%p192_p9), %s1436_s5, 128 }
  0x11   : > { %s742_s13 = sshll.u32 (!%p192_p9), %s218_s8, 4  ;;  %s743_s13 = int_to_ptr.vmem [resolvable:$true] %s742_s13 }
  0x13   : > { %v237_v0 = vld [vmem:[%s1432_s1 + $0x18] sm:$0xff]  ;;  %v236_v1 = vld [vmem:[%s1432_s1 + $0x10] sm:$0xff]  ;;  %v235_v2 = vld [vmem:[%s1432_s1 + $0x8] sm:$0xff]  ;;  %s1446_s9 = smov (!%p220_p10, %s812_s9), 15  ;;  %vm242_vm0 = vcmask 261120  }
  0x14   : > { %279 = vmatpush.msra.mxu0 %v237_v0  ;;  %836 = vmatpush.msra.mxu3 %v237_v0  ;;  %v234_v3 = vld [vmem:[%s1432_s1] sm:$0xff]  ;;  %s813_s14 = sshll.u32 %s1446_s9, 3  ;;  %v675_v12 = vld [vmem:[%s1434_s3 + $0x78] sm:$0xff]  ;;  %v674_v13 = vld [vmem:[%s1434_s3 + $0x70] sm:$0xff]  ;;  %s835_s9 = sshll.u32 %s1048_s22, 6 }
  0x15   : > { %s223_s17 = scalar_lea.vmem %s1431_s0, %s813_s14  ;;  %680 = vmatpush.msra.mxu1 %v675_v12  ;;  %840 = vmatpush.msra.mxu2 %v675_v12  ;;  %v673_v14 = vld [vmem:[%s1434_s3 + $0x68] sm:$0xff]  ;;  %v1111_v15 = vld [vmem:[%s1433_s2] ss:$0 sm:$0xff]  ;;  %v671_v18 = vld [vmem:[%s1434_s3 + $0x58] sm:$0xff]  ;;  %s741_s12 = scalar_lea.hbm %s1436_s5, %s835_s9 }
  0x16   : > { %280 = vmatpush.msra.mxu0 %v236_v1  ;;  %837 = vmatpush.msra.mxu3 %v236_v1  ;;  %v226_v4 = vld [vmem:[%s223_s17] sm:$0xff]  ;;  %v232_v5 = vld [vmem:[%s223_s17 + $0x30] sm:$0xff]  ;;  %v227_v6 = vld [vmem:[%s223_s17 + $0x8] sm:$0xff]  ;;  %s744_s14 = sshll.u32 %s741_s12, 4  ;;  %s745_s14 = int_to_ptr.hbm [resolvable:$true] %s744_s14 }
  0x17   : > { %v233_v7 = vld [vmem:[%s223_s17 + $0x38] sm:$0xff]  ;;  %v228_v8 = vld [vmem:[%s223_s17 + $0x10] sm:$0xff]  ;;  %v230_v10 = vld [vmem:[%s223_s17 + $0x20] sm:$0xff]  ;;  %681 = vmatpush.msra.mxu1 %v674_v13  ;;  %842 = vmatpush.msra.mxu2 %v674_v13  ;;  %s945_s16 = sshra.s32 %s745_s14, 4  ;;  %s946_s16 = int_to_ptr.hbm [resolvable:$true] %s945_s16 }
  0x18   : > { %281 = vmatpush.msra.mxu0 %v235_v2  ;;  %838 = vmatpush.msra.mxu3 %v235_v2  ;;  %v229_v9 = vld [vmem:[%s223_s17 + $0x18] sm:$0xff]  ;;  %v231_v11 = vld [vmem:[%s223_s17 + $0x28] sm:$0xff]  ;;  %v672_v16 = vld [vmem:[%s1434_s3 + $0x60] sm:$0xff]  ;;  %s947_s17 = scalar_lea.hbm %s946_s16, 64  ;;  %p952_p0 = scmp.lt.s32.totalorder %s946_s16, %s1436_s5 }
  0x19   : > { %682 = vmatpush.msra.mxu1 %v673_v14  ;;  %844 = vmatpush.msra.mxu2 %v673_v14  ;;  %v670_v20 = vld [vmem:[%s1434_s3 + $0x50] sm:$0xff]  ;;  %v669_v22 = vld [vmem:[%s1434_s3 + $0x48] sm:$0xff]  ;;  %v668_v25 = vld [vmem:[%s1434_s3 + $0x40] sm:$0xff]  ;;  %p948_p11 = scmp.ne.s32.totalorder %s946_s16, %s947_s17  ;;  %p953_p1 = scmp.lt.s32.totalorder %s951_s25, %s947_s17 }
  0x1a   : > { %282 = vmatpush.msra.mxu0 %v234_v3  ;;  %839 = vmatpush.msra.mxu3 %v234_v3  ;;  %v667_v29 = vld [vmem:[%s1434_s3 + $0x38] sm:$0xff]  ;;  %v666_v33 = vld [vmem:[%s1434_s3 + $0x30] sm:$0xff]  ;;  %v665_v38 = vld [vmem:[%s1434_s3 + $0x28] sm:$0xff] }
  0x1b   : > { %814 = vmatmul.msk.f32.vlgmr.msra.gmra.mxu0 %vm242_vm0, %v226_v4  ;;  %820 = vmatmul.msk.f32.vlgmr.msra.gmra.mxu3 %vm242_vm0, %v232_v5  ;;  %v664_v44 = vld [vmem:[%s1434_s3 + $0x20] sm:$0xff]  ;;  %v663_v52 = vld [vmem:[%s1434_s3 + $0x18] sm:$0xff]  ;;  %v662_v60 = vld [vmem:[%s1434_s3 + $0x10] sm:$0xff]  ;;  %p949_p12 = pnand %p948_p11, %p1065_p5  ;;  %p954_p2 = por %p953_p1, %p952_p0 }
  0x1c   : > { %841 = vmatpush.msrb.mxu3 %v675_v12  ;;  %683 = vmatpush.msra.mxu1 %v672_v16  ;;  %v661_v4 = vld [vmem:[%s1434_s3 + $0x8] sm:$0xff] }
  0x1d   : > { %846 = vmatpush.msra.mxu2 %v672_v16  ;;  %p950_p13 = pneg %p949_p12 }
  0x1e   : > { %843 = vmatpush.msrb.mxu3 %v674_v13  ;;  %684 = vmatpush.msra.mxu1 %v671_v18 }
  0x1f   : > { %848 = vmatpush.msra.mxu2 %v671_v18  ;;  %p955_p3 = pnand %p954_p2, %p950_p13 }
  0x20   : > { %845 = vmatpush.msrb.mxu3 %v673_v14  ;;  %685 = vmatpush.msra.mxu1 %v670_v20 }
  0x21   : > { %850 = vmatpush.msra.mxu2 %v670_v20 }
  0x22   : > { %847 = vmatpush.msrb.mxu3 %v672_v16  ;;  %686 = vmatpush.msra.mxu1 %v669_v22 }
  0x23   : > { %815 = vmatmul.msk.f32.gmra.mxu0 %vm242_vm0, %v227_v6  ;;  %821 = vmatmul.msk.f32.gmra.mxu3 %vm242_vm0, %v233_v7 }
  0x24   : > { %849 = vmatpush.msrb.mxu3 %v671_v18  ;;  %852 = vmatpush.msra.mxu2 %v669_v22 }
  0x25   : > { %687 = vmatpush.msra.mxu1 %v668_v25 }
  0x26   : > { %851 = vmatpush.msrb.mxu3 %v670_v20  ;;  %854 = vmatpush.msra.mxu2 %v668_v25 }
  0x27   : > { %688 = vmatpush.msra.mxu1 %v667_v29 }
  0x28   : > { %853 = vmatpush.msrb.mxu3 %v669_v22  ;;  %856 = vmatpush.msra.mxu2 %v667_v29 }
  0x29   : > { %689 = vmatpush.msra.mxu1 %v666_v33 }
  0x2a   : > { %855 = vmatpush.msrb.mxu3 %v668_v25  ;;  %858 = vmatpush.msra.mxu2 %v666_v33 }
  0x2b   : > { %816 = vmatmul.msk.f32.gmra.mxu0 %vm242_vm0, %v228_v8  ;;  %690 = vmatpush.msra.mxu1 %v665_v38 }
  0x2c   : > { %857 = vmatpush.msrb.mxu3 %v667_v29  ;;  %860 = vmatpush.msra.mxu2 %v665_v38 }
  0x2d   : > { %691 = vmatpush.msra.mxu1 %v664_v44 }
  0x2e   : > { %859 = vmatpush.msrb.mxu3 %v666_v33  ;;  %862 = vmatpush.msra.mxu2 %v664_v44 }
  0x2f   : > { %692 = vmatpush.msra.mxu1 %v663_v52 }
  0x30   : > { %861 = vmatpush.msrb.mxu3 %v665_v38  ;;  %864 = vmatpush.msra.mxu2 %v663_v52 }
  0x31   : > { %693 = vmatpush.msra.mxu1 %v662_v60 }
  0x32   : > { %863 = vmatpush.msrb.mxu3 %v664_v44  ;;  %866 = vmatpush.msra.mxu2 %v662_v60 }
  0x33   : > { %817 = vmatmul.msk.f32.gmra.mxu0 %vm242_vm0, %v229_v9  ;;  %694 = vmatpush.msra.mxu1 %v661_v4 }
  0x34   : > { %865 = vmatpush.msrb.mxu3 %v663_v52  ;;  %868 = vmatpush.msra.mxu2 %v661_v4 }
  0x36   : > { %867 = vmatpush.msrb.mxu3 %v662_v60 }
  0x38   : > { %869 = vmatpush.msrb.mxu3 %v661_v4 }
  0x3b   : > { %818 = vmatmul.msk.f32.gmra.mxu0 %vm242_vm0, %v230_v10 }
  0x43   : > { %819 = vmatmul.msk.f32.gmra.mxu0 %vm242_vm0, %v231_v11  ;;  %v660_v11 = vld [vmem:[%s1434_s3] sm:$0xff] }
  0x44   : > { %695 = vmatpush.msra.mxu1 %v660_v11  ;;  %871 = vmatpush.msrb.mxu3 %v660_v11 }
  0x45   : > { %870 = vmatpush.msra.mxu2 %v660_v11 }
  0x98   : > { %v284_v17 = vpop.f32.mrf.mxu0 }
  0x99   : > { %v1120_v19 = vadd.f32 %v1111_v15, %v284_v17 }
  0x9b   : > { %v1126_v21 = vmul.f32 0.70710677, %v1120_v19 }
  0x9d   : > { %v324_v23 = vmul.f32 %v1126_v21, %v1126_v21 }
  0x9e   : > { %v302_v24 = vpop.f32.mrf.mxu3 }
  0x9f   : > { %v1136_v26 = vmin.f32 %v324_v23, 16.0  ;;  %v1139_v27 = vadd.f32 %v1111_v15, %v302_v24 }
  0xa0   : > { %v287_v28 = vpop.f32.mrf.mxu0 }
  0xa1   : > { %v326_v30 = vmul.f32 2.1237322e-06, %v1136_v26  ;;  %v1146_v31 = vmul.f32 0.70710677, %v1139_v27  ;;  %v1149_v32 = vadd.f32 %v1111_v15, %v287_v28  ;;  %v337_v34 = vmul.f32 3.8918573e-05, %v1136_v26 }
  0xa3   : > { %v327_v35 = vadd.f32 0.00028619796, %v326_v30  ;;  %v564_v36 = vmul.f32 %v1146_v31, %v1146_v31  ;;  %v1158_v37 = vmul.f32 0.70710677, %v1149_v32  ;;  %v338_v39 = vadd.f32 0.001143296, %v337_v34 }
  0xa5   : > { %v328_v40 = vmul.f32 %v327_v35, %v1136_v26  ;;  %v1164_v41 = vmin.f32 %v564_v36, 16.0  ;;  %v364_v42 = vmul.f32 %v1158_v37, %v1158_v37  ;;  %v339_v45 = vmul.f32 %v338_v39, %v1136_v26 }
  0xa6   : > { %v305_v43 = vpop.f32.mrf.mxu3 }
  0xa7   : > { %v329_v46 = vadd.f32 0.0036580483, %v328_v40  ;;  %v566_v47 = vmul.f32 2.1237322e-06, %v1164_v41  ;;  %v577_v48 = vmul.f32 3.8918573e-05, %v1164_v41  ;;  %v1175_v49 = vadd.f32 %v1111_v15, %v305_v43 }
  0xa8   : > { %v1177_v50 = vmin.f32 %v364_v42, 16.0  ;;  %v290_v51 = vpop.f32.mrf.mxu0  ;;  %v340_v53 = vadd.f32 0.014752088, %v339_v45 }
  0xa9   : > { %v330_v54 = vmul.f32 %v329_v46, %v1136_v26  ;;  %v567_v55 = vadd.f32 0.00028619796, %v566_v47  ;;  %v578_v56 = vadd.f32 0.001143296, %v577_v48  ;;  %v1185_v58 = vmul.f32 0.70710677, %v1175_v49 }
  0xaa   : > { %v366_v57 = vmul.f32 2.1237322e-06, %v1177_v50  ;;  %v1188_v59 = vadd.f32 %v1111_v15, %v290_v51  ;;  %v341_v61 = vmul.f32 %v340_v53, %v1136_v26  ;;  %v377_v35 = vmul.f32 3.8918573e-05, %v1177_v50 }
  0xab   : > { %v331_v62 = vadd.f32 0.05243302, %v330_v54  ;;  %v568_v63 = vmul.f32 %v567_v55, %v1164_v41  ;;  %v579_v0 = vmul.f32 %v578_v56, %v1164_v41  ;;  %v604_v2 = vmul.f32 %v1185_v58, %v1185_v58 }
  0xac   : > { %v367_v1 = vadd.f32 0.00028619796, %v366_v57  ;;  %v1199_v3 = vmul.f32 0.70710677, %v1188_v59  ;;  %v342_v7 = vadd.f32 0.112945676, %v341_v61 }
  0xad   : > { %v569_v5 = vadd.f32 0.0036580483, %v568_v63  ;;  %v580_v6 = vadd.f32 0.014752088, %v579_v0  ;;  %v1205_v9 = vmin.f32 %v604_v2, 16.0  ;;  %v332_v20 = vmul.f32 %v331_v62, %v1136_v26 }
  0xae   : > { %v368_v8 = vmul.f32 %v367_v1, %v1177_v50  ;;  %v404_v10 = vmul.f32 %v1199_v3, %v1199_v3  ;;  %v343_v14 = vmul.f32 %v342_v7, %v1136_v26  ;;  %v378_v51 = vadd.f32 0.001143296, %v377_v35 }
  0xaf   : > { %v570_v12 = vmul.f32 %v569_v5, %v1164_v41  ;;  %v581_v13 = vmul.f32 %v580_v6, %v1164_v41  ;;  %v606_v17 = vmul.f32 2.1237322e-06, %v1205_v9  ;;  %v333_v36 = vadd.f32 0.18741608, %v332_v20 }
  0xb0   : > { %v369_v16 = vadd.f32 0.0036580483, %v368_v8  ;;  %v293_v18 = vpop.f32.mrf.mxu0  ;;  %v1218_v28 = vmin.f32 %v404_v10, 16.0  ;;  %v344_v29 = vadd.f32 0.4994258, %v343_v14  ;;  %v1255_v7 = vmul.f32 0.5, %v1139_v27 }
  0xb1   : > { %v571_v22 = vadd.f32 0.05243302, %v570_v12  ;;  %v582_v23 = vadd.f32 0.112945676, %v581_v13  ;;  %v607_v25 = vadd.f32 0.00028619796, %v606_v17  ;;  %v1223_v34 = vadd.f32 %v1111_v15, %v293_v18 }
  0xb2   : > { %v370_v24 = vmul.f32 %v369_v16, %v1177_v50  ;;  %v345_v39 = vmul.f32 %v344_v29, %v1136_v26  ;;  %v406_v43 = vmul.f32 2.1237322e-06, %v1218_v28  ;;  %v334_v52 = vmul.f32 %v333_v36, %v1136_v26 }
  0xb3   : > { %v572_v30 = vmul.f32 %v571_v22, %v1164_v41  ;;  %v583_v33 = vmul.f32 %v582_v23, %v1164_v41  ;;  %v608_v42 = vmul.f32 %v607_v25, %v1205_v9  ;;  %v1231_v46 = vmul.f32 0.70710677, %v1223_v34 }
  0xb4   : > { %v371_v40 = vadd.f32 0.05243302, %v370_v24  ;;  %v1233_v47 = vadd.f32 1.0, %v345_v39  ;;  %v407_v57 = vadd.f32 0.00028619796, %v406_v43  ;;  %v379_v26 = vmul.f32 %v378_v51, %v1177_v50 }
  0xb5   : > { %v584_v38 = vadd.f32 0.4994258, %v583_v33  ;;  %v573_v44 = vadd.f32 0.18741608, %v572_v30  ;;  %v609_v56 = vadd.f32 0.0036580483, %v608_v42  ;;  %v444_v61 = vmul.f32 %v1231_v46, %v1231_v46 }
  0xb6   : > { %915 = vrcp.f32 %v1233_v47  ;;  %v372_v55 = vmul.f32 %v371_v40, %v1177_v50  ;;  %v335_v62 = vadd.f32 1.1283791, %v334_v52  ;;  %v408_v2 = vmul.f32 %v407_v57, %v1218_v28 }
  0xb7   : > { %v585_v45 = vmul.f32 %v584_v38, %v1164_v41  ;;  %v574_v60 = vmul.f32 %v573_v44, %v1164_v41  ;;  %v610_v1 = vmul.f32 %v609_v56, %v1205_v9  ;;  %v1250_v6 = vmin.f32 %v444_v61, 16.0 }
  0xb8   : > { %v296_v48 = vpop.f32.mrf.mxu0  ;;  %v373_v0 = vadd.f32 0.18741608, %v372_v55  ;;  %v336_v12 = vmul.f32 %v335_v62, %v1126_v21  ;;  %v380_v16 = vadd.f32 0.014752088, %v379_v26  ;;  %v409_v22 = vadd.f32 0.0036580483, %v408_v2 }
  0xb9   : > { %v586_v53 = vadd.f32 1.0, %v585_v45  ;;  %v1237_v54 = vadd.f32 %v1111_v15, %v296_v48  ;;  %v575_v5 = vadd.f32 1.1283791, %v574_v60  ;;  %v611_v20 = vadd.f32 0.05243302, %v610_v1 }
  0xba   : > { %v374_v18 = vmul.f32 %v373_v0, %v1177_v50  ;;  %v446_v23 = vmul.f32 2.1237322e-06, %v1250_v6  ;;  %v358_v35 = vand.u32 2147483648, %v1233_v47  ;;  %v381_v38 = vmul.f32 %v380_v16, %v1177_v50 }
  0xbb   : > { %917 = vrcp.f32 %v586_v53  ;;  %v1245_v63 = vmul.f32 0.70710677, %v1237_v54  ;;  %v576_v27 = vmul.f32 %v575_v5, %v1146_v31  ;;  %vm592_vm1 = vweird.f32 %v586_v53 }
  0xbc   : > { %v916_v4 = vpop.eup %915  ;;  %v596_v29 = vand.u32 2147483647, %v586_v53  ;;  %v598_v30 = vand.u32 2147483648, %v586_v53  ;;  %v447_v39 = vadd.f32 0.00028619796, %v446_v23  ;;  %vm352_vm4 = vweird.f32 %v1233_v47 }
  0xbd   : > { %v484_v41 = vmul.f32 %v1245_v63, %v1245_v63  ;;  %v348_v10 = vmul.f32 %v916_v4, %v1233_v47  ;;  %vm353_vm2 = vweird.f32 %v916_v4  ;;  %v356_v42 = vand.u32 2147483647, %v1233_v47 }
  0xbe   : > { %vm1277_vm5 = vmor %vm352_vm4, %vm353_vm2  ;;  %v382_v48 = vadd.f32 0.112945676, %v381_v38  ;;  %v617_v51 = vmul.f32 3.8918573e-05, %v1205_v9  ;;  %vm597_vm7 = vcmp.eq.f32.partialorder %v596_v29, 8.507059e+37  ;;  %v599_v52 = vor.u32 1.1754944e-38, %v598_v30 }
  0xbf   : > { %v1259_v13 = vmin.f32 %v484_v41, 16.0  ;;  %v359_v56 = vor.u32 1.1754944e-38, %v358_v35  ;;  %v448_v26 = vmul.f32 %v447_v39, %v1250_v6  ;;  %vm357_vm8 = vcmp.eq.f32.partialorder %v356_v42, 8.507059e+37 }
  0xc0   : > { %v299_v8 = vpop.f32.mrf.mxu0  ;;  %v383_v60 = vmul.f32 %v382_v48, %v1177_v50  ;;  %v618_v61 = vadd.f32 0.001143296, %v617_v51  ;;  %v375_v41 = vadd.f32 1.1283791, %v374_v18  ;;  %v417_v23 = vmul.f32 3.8918573e-05, %v1218_v28 }
  0xc1   : > { %v918_v11 = vpop.eup %917  ;;  %v1262_v14 = vadd.f32 %v1111_v15, %v299_v8  ;;  %v486_v24 = vmul.f32 2.1237322e-06, %v1259_v13  ;;  %v349_v15 = vsub.f32 1.0, %v348_v10  ;;  %v410_v8 = vmul.f32 %v409_v22, %v1218_v28 }
  0xc2   : > { %v588_v17 = vmul.f32 %v918_v11, %v586_v53  ;;  %vm593_vm3 = vweird.f32 %v918_v11  ;;  %v384_v2 = vadd.f32 0.4994258, %v383_v60  ;;  %v619_v5 = vmul.f32 %v618_v61, %v1205_v9 }
  0xc3   : > { %v1269_v25 = vmul.f32 0.70710677, %v1262_v14  ;;  %v350_v31 = vmul.f32 %v916_v4, %v349_v15  ;;  %v487_v40 = vadd.f32 0.00028619796, %v486_v24  ;;  %vm594_vm6 = vmor %vm592_vm1, %vm593_vm3  ;;  %v612_v24 = vmul.f32 %v611_v20, %v1205_v9 }
  0xc4   : > { %v589_v21 = vsub.f32 1.0, %v588_v17  ;;  %v385_v16 = vmul.f32 %v384_v2, %v1177_v50  ;;  %v620_v17 = vadd.f32 0.014752088, %v619_v5  ;;  %v418_v22 = vadd.f32 0.001143296, %v417_v23 }
  0xc5   : > { %v524_v33 = vmul.f32 %v1269_v25, %v1269_v25  ;;  %v351_v44 = vadd.f32 %v916_v4, %v350_v31  ;;  %v488_v0 = vmul.f32 %v487_v40, %v1259_v13  ;;  %v457_v50 = vmul.f32 3.8918573e-05, %v1250_v6 }
  0xc6   : > { %v590_v36 = vmul.f32 %v918_v11, %v589_v21  ;;  %v449_v21 = vadd.f32 0.0036580483, %v448_v26  ;;  %v1296_v30 = vadd.f32 1.0, %v385_v16  ;;  %v621_v18 = vmul.f32 %v620_v17, %v1205_v9 }
  0xc7   : > { %v1283_v55 = vmin.f32 %v524_v33, 16.0  ;;  %v355_v47 = vsel %vm1277_vm5, %v916_v4, %v351_v44  ;;  %v308_v33 = vmul.f32 0.5, %v1120_v19  ;;  %v613_v20 = vadd.f32 0.18741608, %v612_v24 }
  0xc8   : > { %v591_v43 = vadd.f32 %v918_v11, %v590_v36  ;;  %v360_v1 = vsel %vm357_vm8, %v359_v56, %v355_v47  ;;  %919 = vrcp.f32 %v1296_v30  ;;  %v411_v31 = vadd.f32 0.05243302, %v410_v8 }
  0xc9   : > { %v526_v10 = vmul.f32 2.1237322e-06, %v1283_v55  ;;  %v361_v4 = vmul.f32 %v360_v1, %v336_v12  ;;  %v450_v38 = vmul.f32 %v449_v21, %v1250_v6  ;;  %v622_v40 = vadd.f32 0.112945676, %v621_v18 }
  0xca   : > { %v595_v57 = vsel %vm594_vm6, %v918_v11, %v591_v43  ;;  %v419_v42 = vmul.f32 %v418_v22, %v1218_v28  ;;  %v458_v43 = vadd.f32 0.001143296, %v457_v50  ;;  %v376_v19 = vmul.f32 %v375_v41, %v1158_v37 }
  0xcb   : > { %v600_v62 = vsel %vm597_vm7, %v599_v52, %v595_v57  ;;  %v822_v29 = vclamps-f32 %v361_v4, 1.0  ;;  %v527_v12 = vadd.f32 0.00028619796, %v526_v10  ;;  %v623_v48 = vmul.f32 %v622_v40, %v1205_v9 }
  0xcc   : > { %v601_v53 = vmul.f32 %v600_v62, %v576_v27  ;;  %v489_v27 = vadd.f32 0.0036580483, %v488_v0  ;;  %v420_v51 = vadd.f32 0.014752088, %v419_v42  ;;  %v459_v52 = vmul.f32 %v458_v43, %v1250_v6 }
  0xcd   : > { %v644_v35 = vadd.f32 1.0, %v822_v29  ;;  %v528_v45 = vmul.f32 %v527_v12, %v1283_v55  ;;  %v537_v56 = vmul.f32 3.8918573e-05, %v1283_v55  ;;  %v614_v57 = vmul.f32 %v613_v20, %v1205_v9 }
  0xce   : > { %v828_v11 = vclamps-f32 %v601_v53, 1.0  ;;  %v490_v44 = vmul.f32 %v489_v27, %v1259_v13  ;;  %v412_v47 = vmul.f32 %v411_v31, %v1218_v28  ;;  %v451_v60 = vadd.f32 0.05243302, %v450_v38  ;;  %v920_v61 = vpop.eup %919 }
  0xcf   : > { %v652_v39 = vmul.f32 %v644_v35, %v308_v33  ;;  %v624_v62 = vadd.f32 0.4994258, %v623_v48  ;;  %v421_v26 = vmul.f32 %v420_v51, %v1218_v28  ;;  %v460_v0 = vadd.f32 0.014752088, %v459_v52 }
  0xd0   : > { %v650_v15 = vadd.f32 1.0, %v828_v11  ;;  %v538_v53 = vadd.f32 0.001143296, %v537_v56  ;;  %v491_v1 = vadd.f32 0.05243302, %v490_v44  ;;  %v388_v5 = vmul.f32 %v920_v61, %v1296_v30 }
  0xd1   : > { %696 = vmatmul.f32.vlgmr.msra.gmra.mxu1 %v652_v39  ;;  %v529_v2 = vadd.f32 0.0036580483, %v528_v45  ;;  %v625_v8 = vmul.f32 %v624_v62, %v1205_v9  ;;  %v422_v10 = vadd.f32 0.112945676, %v421_v26  ;;  %v461_v4 = vmul.f32 %v460_v0, %v1250_v6 }
  0xd2   : > { %v658_v36 = vmul.f32 %v650_v15, %v1255_v7  ;;  %v497_v7 = vmul.f32 3.8918573e-05, %v1259_v13  ;;  %v539_v11 = vmul.f32 %v538_v53, %v1283_v55  ;;  %v389_v16 = vsub.f32 1.0, %v388_v5 }
  0xd3   : > { %v396_v17 = vand.u32 2147483647, %v1296_v30  ;;  %v398_v23 = vand.u32 2147483648, %v1296_v30  ;;  %v1322_v21 = vadd.f32 1.0, %v625_v8  ;;  %v423_v27 = vmul.f32 %v422_v10, %v1218_v28 }
  0xd4   : > { %714 = vmatmul.f32.vlgmr.msrb.gmra.mxu3 %v658_v36  ;;  %v498_v37 = vadd.f32 0.001143296, %v497_v7  ;;  %v462_v29 = vadd.f32 0.112945676, %v461_v4  ;;  %v540_v15 = vadd.f32 0.014752088, %v539_v11  ;;  %v390_v22 = vmul.f32 %v920_v61, %v389_v16 }
  0xd5   : > { %v413_v18 = vadd.f32 0.18741608, %v412_v47  ;;  %vm393_vm9 = vweird.f32 %v920_v61  ;;  %v452_v33 = vmul.f32 %v451_v60, %v1250_v6  ;;  %v492_v12 = vmul.f32 %v491_v1, %v1259_v13 }
  0xd6   : > { %v499_v41 = vmul.f32 %v498_v37, %v1259_v13  ;;  %vm392_vm10 = vweird.f32 %v1296_v30  ;;  %921 = vrcp.f32 %v1322_v21  ;;  %v391_v35 = vadd.f32 %v920_v61, %v390_v22 }
  0xd7   : > { %v424_v50 = vadd.f32 0.4994258, %v423_v27  ;;  %v463_v36 = vmul.f32 %v462_v29, %v1250_v6  ;;  %v530_v31 = vmul.f32 %v529_v2, %v1283_v55  ;;  %vm394_vm11 = vmor %vm392_vm10, %vm393_vm9  ;;  %vm397_vm12 = vcmp.eq.f32.partialorder %v396_v17, 8.507059e+37 }
  0xd8   : > { %v500_v24 = vadd.f32 0.014752088, %v499_v41  ;;  %v399_v38 = vor.u32 1.1754944e-38, %v398_v23  ;;  %v541_v39 = vmul.f32 %v540_v15, %v1283_v55  ;;  %v395_v40 = vsel %vm394_vm11, %v920_v61, %v391_v35 }
  0xd9   : > { %v425_v42 = vmul.f32 %v424_v50, %v1218_v28  ;;  %v464_v43 = vadd.f32 0.4994258, %v463_v36  ;;  %v453_v44 = vadd.f32 0.18741608, %v452_v33  ;;  %v493_v45 = vadd.f32 0.18741608, %v492_v12 }
  0xda   : > { %v501_v9 = vmul.f32 %v500_v24, %v1259_v13  ;;  %v400_v7 = vsel %vm397_vm12, %v399_v38, %v395_v40  ;;  %v542_v48 = vadd.f32 0.112945676, %v541_v39  ;;  %v309_v37 = vmul.f32 0.5, %v1149_v32 }
  0xdb   : > { %v401_v51 = vmul.f32 %v400_v7, %v376_v19  ;;  %v1335_v52 = vadd.f32 1.0, %v425_v42  ;;  %v465_v56 = vmul.f32 %v464_v43, %v1250_v6  ;;  %v531_v62 = vadd.f32 0.05243302, %v530_v31 }
  0xdc   : > { %v502_v20 = vadd.f32 0.112945676, %v501_v9  ;;  %v922_v60 = vpop.eup %921  ;;  %v543_v61 = vmul.f32 %v542_v48, %v1283_v55  ;;  %v615_v26 = vadd.f32 1.1283791, %v614_v57  ;;  %v414_v1 = vmul.f32 %v413_v18, %v1218_v28 }
  0xdd   : > { %v823_v0 = vclamps-f32 %v401_v51, 1.0  ;;  %v628_v53 = vmul.f32 %v922_v60, %v1322_v21  ;;  %923 = vrcp.f32 %v1335_v52  ;;  %v454_v19 = vmul.f32 %v453_v44, %v1250_v6 }
  0xde   : > { %v503_v30 = vmul.f32 %v502_v20, %v1259_v13  ;;  %v494_v2 = vmul.f32 %v493_v45, %v1259_v13  ;;  %v1345_v5 = vadd.f32 1.0, %v465_v56  ;;  %v544_v10 = vadd.f32 0.4994258, %v543_v61 }
  0xdf   : > { %v645_v41 = vadd.f32 1.0, %v823_v0  ;;  %v629_v8 = vsub.f32 1.0, %v628_v53  ;;  %v532_v57 = vmul.f32 %v531_v62, %v1283_v55  ;;  %vm632_vm13 = vweird.f32 %v1322_v21 }
  0xe0   : > { %v504_v47 = vadd.f32 0.4994258, %v503_v30  ;;  %v638_v4 = vand.u32 2147483648, %v1322_v21  ;;  %925 = vrcp.f32 %v1345_v5  ;;  %vm633_vm14 = vweird.f32 %v922_v60 }
  0xe1   : > { %v653_v28 = vmul.f32 %v645_v41, %v309_v37  ;;  %v630_v11 = vmul.f32 %v922_v60, %v629_v8  ;;  %v636_v6 = vand.u32 2147483647, %v1322_v21  ;;  %v315_v16 = vmul.f32 0.5, %v1175_v49  ;;  %vm634_vm15 = vmor %vm632_vm13, %vm633_vm14 }
  0xe2   : > { %v505_v32 = vmul.f32 %v504_v47, %v1259_v13  ;;  %v415_v17 = vadd.f32 1.1283791, %v414_v1  ;;  %v545_v13 = vmul.f32 %v544_v10, %v1283_v55  ;;  %v1358_v27 = vmul.f32 0.5, %v1188_v59 }
  0xe3   : > { %v924_v24 = vpop.eup %923  ;;  %v455_v29 = vadd.f32 1.1283791, %v454_v19  ;;  %v495_v15 = vadd.f32 1.1283791, %v494_v2  ;;  %699 = vmatmul.f32.gmra.mxu1 %v653_v28  ;;  %v631_v18 = vadd.f32 %v922_v60, %v630_v11  ;;  %v616_v22 = vmul.f32 %v615_v26, %v1185_v58 }
  0xe4   : > { %v1354_v23 = vadd.f32 1.0, %v505_v32  ;;  %v639_v9 = vor.u32 1.1754944e-38, %v638_v4  ;;  %v428_v49 = vmul.f32 %v924_v24, %v1335_v52  ;;  %v533_v33 = vadd.f32 0.18741608, %v532_v57 }
  0xe5   : > { %v635_v12 = vsel %vm634_vm15, %v922_v60, %v631_v18  ;;  %vm637_vm0 = vcmp.eq.f32.partialorder %v636_v6, 8.507059e+37  ;;  %v1365_v35 = vadd.f32 1.0, %v545_v13  ;;  %v416_v50 = vmul.f32 %v415_v17, %v1199_v3 }
  0xe6   : > { %927 = vrcp.f32 %v1354_v23  ;;  %v926_v59 = vpop.eup %925  ;;  %v640_v36 = vsel %vm637_vm0, %v639_v9, %v635_v12  ;;  %v429_v20 = vsub.f32 1.0, %v428_v49  ;;  %v438_v58 = vand.u32 2147483648, %v1335_v52 }
  0xe7   : > { %v456_v21 = vmul.f32 %v455_v29, %v1231_v46  ;;  %v496_v31 = vmul.f32 %v495_v15, %v1245_v63  ;;  %v641_v38 = vmul.f32 %v640_v36, %v616_v22  ;;  %v468_v39 = vmul.f32 %v926_v59, %v1345_v5 }
  0xe8   : > { %v430_v40 = vmul.f32 %v924_v24, %v429_v20  ;;  %vm433_vm1 = vweird.f32 %v924_v24  ;;  %v436_v42 = vand.u32 2147483647, %v1335_v52  ;;  %929 = vrcp.f32 %v1365_v35 }
  0xe9   : > { %v534_v43 = vmul.f32 %v533_v33, %v1283_v55  ;;  %v829_v3 = vclamps-f32 %v641_v38, 1.0  ;;  %vm432_vm2 = vweird.f32 %v1335_v52  ;;  %v469_v30 = vsub.f32 1.0, %v468_v39 }
  0xea   : > { %v431_v45 = vadd.f32 %v924_v24, %v430_v40  ;;  %v439_v46 = vor.u32 1.1754944e-38, %v438_v58  ;;  %v476_v63 = vand.u32 2147483647, %v1345_v5  ;;  %v478_v7 = vand.u32 2147483648, %v1345_v5  ;;  %vm434_vm3 = vmor %vm432_vm2, %vm433_vm1 }
  0xeb   : > { %v651_v48 = vadd.f32 1.0, %v829_v3  ;;  %v470_v51 = vmul.f32 %v926_v59, %v469_v30  ;;  %vm473_vm4 = vweird.f32 %v926_v59  ;;  %vm437_vm5 = vcmp.eq.f32.partialorder %v436_v42, 8.507059e+37 }
  0xec   : > { %v928_v44 = vpop.eup %927  ;;  %v435_v47 = vsel %vm434_vm3, %v924_v24, %v431_v45  ;;  %vm472_vm6 = vweird.f32 %v1345_v5  ;;  %v516_v55 = vand.u32 2147483647, %v1354_v23  ;;  %vm477_vm8 = vcmp.eq.f32.partialorder %v476_v63, 8.507059e+37 }
  0xed   : > { %v508_v56 = vmul.f32 %v928_v44, %v1354_v23  ;;  %v659_v52 = vmul.f32 %v651_v48, %v315_v16  ;;  %v440_v60 = vsel %vm437_vm5, %v439_v46, %v435_v47  ;;  %v471_v37 = vadd.f32 %v926_v59, %v470_v51  ;;  %vm474_vm7 = vmor %vm472_vm6, %vm473_vm4 }
  0xee   : > { %v930_v61 = vpop.eup %929  ;;  %v441_v26 = vmul.f32 %v440_v60, %v416_v50  ;;  %v479_v0 = vor.u32 1.1754944e-38, %v478_v7  ;;  %v518_v53 = vand.u32 2147483648, %v1354_v23  ;;  %vm513_vm9 = vweird.f32 %v928_v44 }
  0xef   : > { %v509_v62 = vsub.f32 1.0, %v508_v56  ;;  %717 = vmatmul.f32.gmra.mxu3 %v659_v52  ;;  %v475_v1 = vsel %vm474_vm7, %v926_v59, %v471_v37  ;;  %v548_v2 = vmul.f32 %v930_v61, %v1365_v35  ;;  %v535_v5 = vadd.f32 1.1283791, %v534_v43 }
  0xf0   : > { %v824_v41 = vclamps-f32 %v441_v26, 1.0  ;;  %v480_v8 = vsel %vm477_vm8, %v479_v0, %v475_v1  ;;  %vm512_vm10 = vweird.f32 %v1354_v23  ;;  %vm517_vm11 = vcmp.eq.f32.partialorder %v516_v55, 8.507059e+37 }
  0xf1   : > { %v510_v19 = vmul.f32 %v928_v44, %v509_v62  ;;  %v481_v32 = vmul.f32 %v480_v8, %v456_v21  ;;  %v549_v57 = vsub.f32 1.0, %v548_v2  ;;  %vm514_vm12 = vmor %vm512_vm10, %vm513_vm9  ;;  %v519_v28 = vor.u32 1.1754944e-38, %v518_v53 }
  0xf2   : > { %v646_v4 = vadd.f32 1.0, %v824_v41  ;;  %v556_v11 = vand.u32 2147483647, %v1365_v35  ;;  %v558_v6 = vand.u32 2147483648, %v1365_v35  ;;  %vm553_vm13 = vweird.f32 %v930_v61 }
  0xf3   : > { %v511_v10 = vadd.f32 %v928_v44, %v510_v19  ;;  %v825_v16 = vclamps-f32 %v481_v32, 1.0  ;;  %v550_v13 = vmul.f32 %v930_v61, %v549_v57  ;;  %v311_v24 = vmul.f32 0.5, %v1223_v34 }
  0xf4   : > { %v654_v29 = vmul.f32 %v646_v4, %v1358_v27  ;;  %vm552_vm14 = vweird.f32 %v1365_v35  ;;  %v536_v9 = vmul.f32 %v535_v5, %v1269_v25  ;;  %v559_v49 = vor.u32 1.1754944e-38, %v558_v6 }
  0xf5   : > { %v515_v17 = vsel %vm514_vm12, %v928_v44, %v511_v10  ;;  %v647_v15 = vadd.f32 1.0, %v825_v16  ;;  %v551_v22 = vadd.f32 %v930_v61, %v550_v13  ;;  %vm554_vm15 = vmor %vm552_vm14, %vm553_vm13  ;;  %vm557_vm0 = vcmp.eq.f32.partialorder %v556_v11, 8.507059e+37 }
  0xf6   : > { %v520_v23 = vsel %vm517_vm11, %v519_v28, %v515_v17  ;;  %702 = vmatmul.f32.gmra.mxu1 %v654_v29  ;;  %v312_v36 = vmul.f32 0.5, %v1237_v54  ;;  %v313_v25 = vmul.f32 0.5, %v1262_v14 }
  0xf7   : > { %v521_v18 = vmul.f32 %v520_v23, %v496_v31  ;;  %v655_v33 = vmul.f32 %v647_v15, %v311_v24  ;;  %v555_v59 = vsel %vm554_vm15, %v930_v61, %v551_v22  ;;  %v914_v31 = vld [vmem:[%s1435_s4] ss:$0 sm:$0xff] }
  0xf8   : > { %v560_v34 = vsel %vm557_vm0, %v559_v49, %v555_v59 }
  0xf9   : > { %v826_v12 = vclamps-f32 %v521_v18, 1.0  ;;  %705 = vmatmul.f32.vlgmr.msra.gmra.mxu2 %v655_v33  ;;  %v561_v50 = vmul.f32 %v560_v34, %v536_v9 }
  0xfb   : > { %v648_v27 = vadd.f32 1.0, %v826_v12  ;;  %v827_v58 = vclamps-f32 %v561_v50, 1.0 }
  0xfd   : > { %v656_v20 = vmul.f32 %v648_v27, %v312_v36  ;;  %v649_v35 = vadd.f32 1.0, %v827_v58 }
  0xff   : > { %v657_v21 = vmul.f32 %v649_v35, %v313_v25 }
 0x101   : > { %708 = vmatmul.f32.gmra.mxu2 %v656_v20 }
 0x109   : > { %711 = vmatmul.f32.gmra.mxu2 %v657_v21 }
 0x14e   : > { %v697_v38 = vpop.f32.mrf.mxu1 }
 0x14f   : > { %v698_v39 = vadd.f32 %v914_v31, %v697_v38 }
 0x151   : > { %721 = vst [vmem:[%s218_s8] sm:$0xff] %v698_v39 }
 0x157   : > { %v715_v54 = vpop.f32.mrf.mxu3 }
 0x158   : > { %v716_v40 = vadd.f32 %v914_v31, %v715_v54 }
 0x15a   : > { %727 = vst [vmem:[%s218_s8 + $0x30] sm:$0xff] %v716_v40 }
 0x160   : > { %v700_v42 = vpop.f32.mrf.mxu1 }
 0x161   : > { %v701_v43 = vadd.f32 %v914_v31, %v700_v42 }
 0x163   : > { %722 = vst [vmem:[%s218_s8 + $0x8] sm:$0xff] %v701_v43 }
 0x172   : > { %v718_v14 = vpop.f32.mrf.mxu3 }
 0x173   : > { %v703_v3 = vpop.f32.mrf.mxu1  ;;  %v719_v30 = vadd.f32 %v914_v31, %v718_v14 }
 0x174   : > { %v704_v44 = vadd.f32 %v914_v31, %v703_v3 }
 0x175   : > { %728 = vst [vmem:[%s218_s8 + $0x38] sm:$0xff] %v719_v30 }
 0x176   : > { %723 = vst [vmem:[%s218_s8 + $0x10] sm:$0xff] %v704_v44 }
 0x17c   : > { %v706_v45 = vpop.f32.mrf.mxu2 }
 0x17d   : > { %v707_v46 = vadd.f32 %v914_v31, %v706_v45 }
 0x17f   : > { %724 = vst [vmem:[%s218_s8 + $0x18] sm:$0xff] %v707_v46 }
 0x184   : > { %v709_v63 = vpop.f32.mrf.mxu2 }
 0x185   : > { %v710_v7 = vadd.f32 %v914_v31, %v709_v63 }
 0x187   : > { %725 = vst [vmem:[%s218_s8 + $0x20] sm:$0xff] %v710_v7 }
 0x18c   : > { %v712_v48 = vpop.f32.mrf.mxu2 }
 0x18d   : > { %v713_v51 = vadd.f32 %v914_v31, %v712_v48 }
 0x18f   : > { %726 = vst [vmem:[%s218_s8 + $0x28] sm:$0xff] %v713_v51 }
 0x190   : > { %958 = shalt.err (!%p955_p3)
}
 0x191   : > { %s995_s26 = smov 128   ;;  %s996_s7 = smov 8  }
 0x192   : > { %872 = dma.vmem_to_hbm [thread:$0]  (%p1065_p5), %s743_s13, 1024, %s745_s14, %s730_s15, %s995_s26, %s995_s26, %s996_s7  }
 0x193 PF: > { %p878_p4 = scmp.ge.s32.totalorder %s993_s21, 2  ;;  %s759_s8 = sand.u32 1, %s981_s18  }
 0x194   : > { %s760_s9 = scalar_lea.sflag [#allocation3], %s759_s8 }
 0x195   : > { %p875_p7 = pnand %p878_p4, %p1069_p6 }
 0x197   : > { %p876_p8 = pneg %p875_p7 }
 0x199   : > { %976 = dma.done.wait (%p876_p8), %s760_s9, 1024  }
 0x19a   : > { %978 = vsyncadd (%p876_p8), %s760_s9, 4294966272  ;;  %p15_p9 = scmp.ge.s32.totalorder %s1052_s24, 4   ;;  %s1441_s18 = smov %s985_s19 }
 0x19b   : > { %s1442_s19 = smov %s989_s20  ;;  %s1443_s20 = smov %s1063_s27 }
 0x19c   : > { %s1444_s21 = smov %s1052_s24  ;;  %17 = sbr.rel (!%p15_p9) target bundleno = 3 (0x3), region = 75 }
 0x1a1   :  { %766 = vsyncpa [#allocation3], 1 }
 0x1a2   :  { %768 = vsyncpa [#allocation3 + $0x1], 1 }

</bundles_post_ra>
